<compile_context>
chip_gen: v5e
topology: v5e:2x2
jax: 0.10.0
libtpu: 0.0.40
codegen_flags: <defaults>
</compile_context>

<pallas_src>
import jax
import jax.numpy as jnp
from jax.experimental import pallas as pl
from jax.experimental.pallas import tpu as pltpu

_LANE = 128


def _frozen_bn_kernel(x_ref, scale_ref, shift_ref, o_ref):
    # x: (tm, tn); scale/shift: (tm, 1) f32, broadcast across lanes.
    o_ref[...] = (x_ref[...] * scale_ref[...] + shift_ref[...]).astype(o_ref.dtype)


def _choose_tiles(m, k, itemsize, row_align, target_bytes=2 * 1024 * 1024):
    """Pick a lane-dense tile of roughly `target_bytes` (data tile; in+out are
    double-buffered by the pipeline, so 4x this must fit scoped VMEM)."""
    target_elems = max(row_align * _LANE, target_bytes // itemsize)

    # Lane (column) tile: whole spatial extent if it fits, else a 128-multiple
    # chunk small enough to still allow >= row_align rows in the budget.
    max_tn = max(_LANE, (target_elems // row_align) // _LANE * _LANE)
    tn = k if k <= max_tn else max_tn          # full dim is legal even if k % 128 != 0

    # Sublane (row) tile from the remaining budget.
    max_tm = max(row_align, (target_elems // max(tn, 1)) // row_align * row_align)
    tm = m if m <= max_tm else max_tm          # full dim is legal for any m
    return tm, tn


def frozen_batch_norm_2d(x, weight, bias, running_mean, running_var, eps=1e-5):
    """x: (N, C, H, W). Returns same shape/dtype. Eval-mode frozen batch norm."""
    n, c, h, w = x.shape
    out_dtype = x.dtype

    # Per-channel affine, computed once in f32 in the wrapper (tiny (C,) op).
    scale = weight.astype(jnp.float32) * jax.lax.rsqrt(
        running_var.astype(jnp.float32) + jnp.float32(eps))
    shift = bias.astype(jnp.float32) - running_mean.astype(jnp.float32) * scale

    # NCHW-native view: rows = (n, c) pairs, lanes = spatial. Free reshape.
    m, k = n * c, h * w
    x2 = x.reshape(m, k)
    scale_rows = jnp.broadcast_to(scale[None, :], (n, c)).reshape(m, 1)
    shift_rows = jnp.broadcast_to(shift[None, :], (n, c)).reshape(m, 1)

    itemsize = jnp.dtype(out_dtype).itemsize
    # Sublane packing: 8 rows/vreg for f32, 16 for bf16, 32 for int8.
    row_align = 8 * max(1, 4 // max(1, itemsize))
    tm, tn = _choose_tiles(m, k, itemsize, row_align)

    grid = (pl.cdiv(m, tm), pl.cdiv(k, tn))

    out2 = pl.pallas_call(
        _frozen_bn_kernel,
        out_shape=jax.ShapeDtypeStruct((m, k), out_dtype),
        grid_spec=pltpu.PrefetchScalarGridSpec(
            num_scalar_prefetch=0,
            grid=grid,
            in_specs=[
                pl.BlockSpec((tm, tn), lambda i, j: (i, j)),   # x tile
                pl.BlockSpec((tm, 1), lambda i, j: (i, 0)),    # per-row scale
                pl.BlockSpec((tm, 1), lambda i, j: (i, 0)),    # per-row shift
            ],
            out_specs=pl.BlockSpec((tm, tn), lambda i, j: (i, j)),
        ),
        compiler_params=pltpu.CompilerParams(
            dimension_semantics=("parallel", "parallel"),
            vmem_limit_bytes=32 * 1024 * 1024),
    )(x2, scale_rows, shift_rows)

    return out2.reshape(n, c, h, w)


if __name__ == "__main__":
    key = jax.random.PRNGKey(0)
    N, C, H, W = 2, 4, 16, 16
    eps = 1e-5

    kx, kw, kb, km, kv = jax.random.split(key, 5)
    x = jax.random.normal(kx, (N, C, H, W), dtype=jnp.float32)

    # Frozen buffers (module init: weight=1, bias=0, mean=0, var=1-eps; perturbed
    # so the test is non-trivial).
    weight = jnp.ones((C,), jnp.float32) + 0.1 * jax.random.normal(kw, (C,))
    bias = jnp.zeros((C,), jnp.float32) + 0.1 * jax.random.normal(kb, (C,))
    running_mean = jnp.zeros((C,), jnp.float32) + 0.1 * jax.random.normal(km, (C,))
    running_var = (jnp.ones((C,), jnp.float32) - eps
                   + 0.05 * jnp.abs(jax.random.normal(kv, (C,))))

    out = frozen_batch_norm_2d(x, weight, bias, running_mean, running_var, eps=eps)
    out = jax.block_until_ready(out)

    # Pure-JAX reference (eval-mode F.batch_norm semantics).
    scale = weight * jax.lax.rsqrt(running_var + eps)
    shift = bias - running_mean * scale
    ref = x * scale.reshape(1, C, 1, 1) + shift.reshape(1, C, 1, 1)

    assert out.shape == x.shape and out.dtype == x.dtype
    assert jnp.allclose(out, ref, atol=1e-5, rtol=1e-5)
    print("KERNEL_OK")
</pallas_src>

<mosaic_0001>
module attributes {stable_mosaic.version = 11 : i64} {
  func.func @_frozen_bn_kernel(%arg0: i32, %arg1: i32, %arg2: memref<8x256xf32, #tpu.memory_space<vmem>>, %arg3: memref<8x1xf32, #tpu.memory_space<vmem>>, %arg4: memref<8x1xf32, #tpu.memory_space<vmem>>, %arg5: memref<8x256xf32, #tpu.memory_space<vmem>>) attributes {dimension_semantics = [#tpu.dimension_semantics<parallel>, #tpu.dimension_semantics<parallel>], iteration_bounds = array<i64: 1, 1>, scalar_prefetch = 0 : i64, scratch_operands = 0 : i64, tpu.core_type = #tpu.core_type<tc>, window_params = [{transform_indices = @transform_0, window_bounds = array<i64: 8, 256>}, {transform_indices = @transform_1, window_bounds = array<i64: 8, 1>}, {transform_indices = @transform_2, window_bounds = array<i64: 8, 1>}, {transform_indices = @transform_3, window_bounds = array<i64: 8, 256>}]} {
    %c0 = arith.constant 0 : index
    %c0_0 = arith.constant 0 : index
    %0 = vector.load %arg2[%c0, %c0_0] : memref<8x256xf32, #tpu.memory_space<vmem>>, vector<8x256xf32>
    %c0_1 = arith.constant 0 : index
    %c0_2 = arith.constant 0 : index
    %1 = vector.load %arg3[%c0_1, %c0_2] : memref<8x1xf32, #tpu.memory_space<vmem>>, vector<8x1xf32>
    %2 = vector.broadcast %1 : vector<8x1xf32> to vector<8x256xf32>
    %3 = arith.mulf %0, %2 : vector<8x256xf32>
    %c0_3 = arith.constant 0 : index
    %c0_4 = arith.constant 0 : index
    %4 = vector.load %arg4[%c0_3, %c0_4] : memref<8x1xf32, #tpu.memory_space<vmem>>, vector<8x1xf32>
    %5 = vector.broadcast %4 : vector<8x1xf32> to vector<8x256xf32>
    %6 = arith.addf %3, %5 : vector<8x256xf32>
    %c0_5 = arith.constant 0 : index
    %c0_6 = arith.constant 0 : index
    %7 = vector.load %arg5[%c0_5, %c0_6] : memref<8x256xf32, #tpu.memory_space<vmem>>, vector<8x256xf32>
    tpu.vector_store %arg5[%c0_5, %c0_6], %6 {strides = array<i32>} : memref<8x256xf32, #tpu.memory_space<vmem>>, vector<8x256xf32>,
    return
  }
  func.func @transform_0(%arg0: i32, %arg1: i32) -> (i32, i32) {
    %c0_i32 = arith.constant 0 : i32
    return %arg0, %arg1 : i32, i32
  }
  func.func @transform_1(%arg0: i32, %arg1: i32) -> (i32, i32) {
    %c0_i32 = arith.constant 0 : i32
    %c0_i32_0 = arith.constant 0 : i32
    return %arg0, %c0_i32 : i32, i32
  }
  func.func @transform_2(%arg0: i32, %arg1: i32) -> (i32, i32) {
    %c0_i32 = arith.constant 0 : i32
    %c0_i32_0 = arith.constant 0 : i32
    return %arg0, %c0_i32 : i32, i32
  }
  func.func @transform_3(%arg0: i32, %arg1: i32) -> (i32, i32) {
    %c0_i32 = arith.constant 0 : i32
    return %arg0, %arg1 : i32, i32
  }
}

</mosaic_0001>

<bundles_post_ra>
// kernel: tpu_custom_call.1
= control target key start
LH: loop header
LB: loop body
LE: loop exit
PB: predicated region body
PF: predicated region fallthrough
CT: control target
= control target key end

     0   :  { %s117_s0 = inlined_call_operand.vmem [shape: f32[8,256], index: 0, kind: input, shape index: {}]   ;;  %s118_s1 = inlined_call_operand.vmem [shape: f32[8,1], index: 1, kind: input, shape index: {}]   ;;  %s119_s2 = inlined_call_operand.vmem [shape: f32[8,1], index: 2, kind: input, shape index: {}]   ;;  %s120_s3 = inlined_call_operand.hbm [shape: f32[8,256], index: 3, kind: output, shape index: {}]  }
   0x1   :  { %v17_v0 = vld [vmem:[%s118_s1] sm:$0xff] }
   0x2   :  { %8 = vsyncpa [#allocation3], 0  ;;  %v80_v1 = vmov 0   ;;  %v25_v2 = vld [vmem:[%s119_s2] sm:$0xff]  ;;  %v16_v5 = vld [vmem:[%s117_s0 + $0x8] sm:$0xff]  ;;  %s81_s1 = smov [#allocation2]  }
   0x3   :  { %53 = vset.pattern.permute.xlu0 %v80_v1  ;;  %v15_v4 = vld [vmem:[%s117_s0] sm:$0xff]  ;;  %s40_s20 = sshll.u32 %s81_s1, 4  ;;  %s42_s23 = sshll.u32 %s120_s3, 4  ;;  %s41_s20 = int_to_ptr.vmem [resolvable:$true] %s40_s20  ;;  %s43_s23 = int_to_ptr.hbm [resolvable:$true] %s42_s23 }
   0x4   :  { %20 = vperm.xlu0 %53, %v17_v0  }
   0xc   :  { %28 = vperm.xlu0 %53, %v25_v2  }
  0x76   :  { %v21_v3 = vpop.permute.xlu0 %20 }
  0x77   :  { %v23_v6 = vmul.f32 %v21_v3, %v15_v4  ;;  %v24_v7 = vmul.f32 %v21_v3, %v16_v5 }
  0x7e   :  { %v29_v8 = vpop.permute.xlu0 %28 }
  0x7f   :  { %v31_v9 = vadd.f32 %v29_v8, %v23_v6  ;;  %v32_v10 = vadd.f32 %v29_v8, %v24_v7 }
  0x81   :  { %33 = vst [vmem:[#allocation2] sm:$0xff] %v31_v9 }
  0x82   :  { %34 = vst [vmem:[#allocation2 + $0x8] sm:$0xff] %v32_v10 }
  0x83   :  { %45 = dma.vmem_to_hbm [thread:$0]  %s41_s20, 256, %s43_s23, [#allocation3]  }
  0x84   :  { %78 = dma.done.wait [#allocation3], 256  }
  0x85   :  { %79 = vsyncadd [#allocation3], 4294967040 }
  0x86   :  { %50 = vsyncpa [#allocation3], 1 }

</bundles_post_ra>
